<compile_context>
chip_gen: v7x
topology: tpu7x:2x2x1
jax: 0.10.0
libtpu: 0.0.40
codegen_flags: <defaults>
</compile_context>

<pallas_src>
import jax
import jax.numpy as jnp
from jax.experimental import pallas as pl
from jax.experimental.pallas import tpu as pltpu


_MAX_BATCH_TILE = 256  # caps the lane-padded (tb, 1) f32 scale block at ~128 KiB / buffer


def _round_up(x, m):
    return ((x + m - 1) // m) * m


def _target_block_bytes():
    """Per-generation per-block byte target for the x / out tiles."""
    try:
        kind = jax.devices()[0].device_kind.lower()
    except Exception:
        kind = ""
    if "v7" in kind or "tpu7" in kind:
        # 4 MiB blocks: 4 double-buffered x/out buffers = 16 MiB, well inside the
        # 32 MiB scoped default of the 64 MiB VMEM; step overhead drops <10%.
        return 4 * 1024 * 1024
    # v5e (16 MiB scoped default) / v6e (32 MiB): ~2 MiB is already near roofline.
    return 2 * 1024 * 1024


def _choose_tiles(B, N, itemsize, target_bytes):
    """Pick (tb, tf) for the flattened [B, N] layout (cdiv-style tiling).

    tf is always a multiple of 128 (lane-dense, unmasked stores) and need not
    divide N; tb is a multiple of 8 (or == B when B <= 8).  Ragged last blocks
    are padded/masked by Pallas.
    """
    budget_elems = max(8 * 128, target_bytes // max(itemsize, 1))

    # Smallest legal batch tile.
    tb = B if B <= 8 else 8

    # Lane tile: multiple of 128, within the byte budget, no larger than the
    # 128-rounded row.
    n128 = _round_up(N, 128)
    tf_budget = max(128, ((budget_elems // tb) // 128) * 128)
    tf = min(n128, tf_budget)

    # If one feature block covers a whole row with budget to spare, span more
    # batch rows per block to amortize the ~0.35 us per-grid-step overhead.
    if tf >= n128 and B > tb:
        rows = budget_elems // tf
        tb_grow = min(_MAX_BATCH_TILE, _round_up(B, 8), (rows // 8) * 8)
        tb = max(tb, tb_grow)

    # Never collapse to a (1, 1) grid: keep >=2 steps on a "parallel" axis so
    # v7x can shard across its two TensorCores and the pipeline can overlap.
    if pl.cdiv(B, tb) * pl.cdiv(N, tf) == 1:
        if N > 128:
            tf = _round_up(pl.cdiv(N, 2), 128)   # guaranteed < N for N > 128
        elif B > 8:
            tb = max(8, _round_up(pl.cdiv(B, 2), 8))
        # else: whole tensor is <= 8x128 elements; nothing worth splitting.

    return tb, tf


def _drop_path_kernel(scale_ref, x_ref, o_ref):
    # scale_ref: VMEM (tb, 1) float32 -- 0.0 or 1/keep_prob per sample row.
    # x_ref / o_ref: VMEM (tb, tf) in the input dtype.
    # Multiply in f32 (exact for the {0, 1/keep_prob} scale); single final cast.
    # The kernel is HBM-bound on every generation, so the upcast is free.
    o_ref[...] = (x_ref[...].astype(jnp.float32) * scale_ref[...]).astype(o_ref.dtype)


def drop_path_pallas(x, drop_prob, net_mode, key, *, donate_x=False):
    """Pallas implementation of drop_path(x, drop_prob, net_mode).

    x: [B, ...] float array (e.g. NCHW).  drop_prob: static python float.
    net_mode: 'train' or anything else.  key: JAX PRNG key standing in for
    torch.rand((B, 1, 1, 1)).  Set donate_x=True when the caller does not
    reuse x (residual-branch case) to alias the output onto the input buffer.
    """
    if drop_prob is None or drop_prob == 0.0 or net_mode != "train":
        return x

    # NOTE: drop_prob == 1.0 divides by zero exactly as the PyTorch reference.
    keep_prob = 1.0 - float(drop_prob)
    B = x.shape[0]
    N = 1
    for d in x.shape[1:]:
        N *= d
    itemsize = jnp.dtype(x.dtype).itemsize

    # Per-sample scale in f32: floor(keep_prob + U[0,1)) / keep_prob,
    # i.e. 0.0 (dropped path) or 1/keep_prob (kept path).
    u = jax.random.uniform(key, (B, 1), dtype=jnp.float32)
    scale = jnp.floor(keep_prob + u) / keep_prob

    x2 = x.reshape(B, N)  # free reshape on contiguous NCHW
    tb, tf = _choose_tiles(B, N, itemsize, _target_block_bytes())
    grid = (pl.cdiv(B, tb), pl.cdiv(N, tf))  # ragged last blocks padded/masked

    out2 = pl.pallas_call(
        _drop_path_kernel,
        out_shape=jax.ShapeDtypeStruct((B, N), x.dtype),
        grid=grid,
        in_specs=[
            pl.BlockSpec((tb, 1), lambda i, j: (i, 0)),    # per-sample scale (f32)
            pl.BlockSpec((tb, tf), lambda i, j: (i, j)),   # lane-dense x tile
        ],
        out_specs=pl.BlockSpec((tb, tf), lambda i, j: (i, j)),
        compiler_params=pltpu.CompilerParams(
            dimension_semantics=("parallel", "parallel"),
        ),
        cost_estimate=pl.CostEstimate(
            flops=B * N,
            transcendentals=0,
            bytes_accessed=2 * B * N * itemsize + 4 * B,
        ),
        input_output_aliases=({1: 0} if donate_x else {}),
    )(scale, x2)
    return out2.reshape(x.shape)


class DropPath:
    """Mirror of the PyTorch DropPath module (forward only)."""

    def __init__(self, drop_prob=None, net_mode="train"):
        self.drop_prob = drop_prob
        self.net_mode = net_mode

    def __call__(self, x, key, donate_x=False):
        return drop_path_pallas(x, self.drop_prob, self.net_mode, key,
                                donate_x=donate_x)


def _reference(x, drop_prob, key):
    keep_prob = 1.0 - drop_prob
    B = x.shape[0]
    u = jax.random.uniform(key, (B, 1), dtype=jnp.float32)
    scale = (jnp.floor(keep_prob + u) / keep_prob).reshape((B,) + (1,) * (x.ndim - 1))
    return (x.astype(jnp.float32) * scale).astype(x.dtype)


if __name__ == "__main__":
    key = jax.random.PRNGKey(0)
    kx, kr, kx2, kr2, kx3, kr3 = jax.random.split(key, 6)

    drop_prob = 0.3

    # Main test: NCHW feature map, batch=2, channels=4, spatial=16x16.
    B, C, H, W = 2, 4, 16, 16
    x = jax.random.normal(kx, (B, C, H, W), dtype=jnp.float32)
    mod = DropPath(drop_prob=drop_prob, net_mode="train")
    out = jax.block_until_ready(mod(x, kr))
    ref = _reference(x, drop_prob, kr)
    assert jnp.allclose(out, ref, atol=1e-6), "train-mode mismatch vs reference"

    # Odd, non-128-aligned shape exercises cdiv tiling with padded last block.
    x_odd = jax.random.normal(kx2, (3, 5, 7, 9), dtype=jnp.float32)
    out_odd = jax.block_until_ready(drop_path_pallas(x_odd, drop_prob, "train", kr2))
    ref_odd = _reference(x_odd, drop_prob, kr2)
    assert jnp.allclose(out_odd, ref_odd, atol=1e-6), "odd-shape mismatch vs reference"

    # bf16 input: kernel multiplies in f32 with a single final rounding.
    x_bf = jax.random.normal(kx3, (B, C, H, W), dtype=jnp.bfloat16)
    out_bf = jax.block_until_ready(drop_path_pallas(x_bf, drop_prob, "train", kr3))
    ref_bf = _reference(x_bf, drop_prob, kr3)
    assert jnp.allclose(out_bf.astype(jnp.float32), ref_bf.astype(jnp.float32)), \
        "bf16 mismatch vs reference"

    # Donated path (caller does not reuse x afterwards).
    x_don = x + 0.0
    ref_don = _reference(x_don, drop_prob, kr)
    out_don = jax.block_until_ready(
        drop_path_pallas(x_don, drop_prob, "train", kr, donate_x=True))
    assert jnp.allclose(out_don, ref_don, atol=1e-6), "donated-path mismatch"

    # Eval mode / drop_prob == 0 are identity passthroughs.
    out_eval = jax.block_until_ready(DropPath(drop_prob, "eval")(x, kr))
    assert jnp.array_equal(out_eval, x)
    out_p0 = jax.block_until_ready(DropPath(0.0, "train")(x, kr))
    assert jnp.array_equal(out_p0, x)

    print("KERNEL_OK")
</pallas_src>

<mosaic_0001>
module attributes {stable_mosaic.version = 11 : i64} {
  func.func @_drop_path_kernel(%arg0: i32, %arg1: i32, %arg2: memref<2x1xf32, #tpu.memory_space<vmem>>, %arg3: memref<2x512xf32, #tpu.memory_space<vmem>>, %arg4: memref<2x512xf32, #tpu.memory_space<vmem>>) attributes {dimension_semantics = [#tpu.dimension_semantics<parallel>, #tpu.dimension_semantics<parallel>], iteration_bounds = array<i64: 1, 2>, scalar_prefetch = 0 : i64, scratch_operands = 0 : i64, tpu.core_type = #tpu.core_type<tc>, window_params = [{transform_indices = @transform_0, window_bounds = array<i64: 2, 1>}, {transform_indices = @transform_1, window_bounds = array<i64: 2, 512>}, {transform_indices = @transform_2, window_bounds = array<i64: 2, 512>}]} {
    %c0 = arith.constant 0 : index
    %c0_0 = arith.constant 0 : index
    %0 = vector.load %arg3[%c0, %c0_0] : memref<2x512xf32, #tpu.memory_space<vmem>>, vector<2x512xf32>
    %c0_1 = arith.constant 0 : index
    %c0_2 = arith.constant 0 : index
    %1 = vector.load %arg2[%c0_1, %c0_2] : memref<2x1xf32, #tpu.memory_space<vmem>>, vector<2x1xf32>
    %2 = vector.broadcast %1 : vector<2x1xf32> to vector<2x512xf32>
    %3 = arith.mulf %0, %2 : vector<2x512xf32>
    %c0_3 = arith.constant 0 : index
    %c0_4 = arith.constant 0 : index
    %4 = vector.load %arg4[%c0_3, %c0_4] : memref<2x512xf32, #tpu.memory_space<vmem>>, vector<2x512xf32>
    tpu.vector_store %arg4[%c0_3, %c0_4], %3 {strides = array<i32>} : memref<2x512xf32, #tpu.memory_space<vmem>>, vector<2x512xf32>,
    return
  }
  func.func @transform_0(%arg0: i32, %arg1: i32) -> (i32, i32) {
    %c0_i32 = arith.constant 0 : i32
    %c0_i32_0 = arith.constant 0 : i32
    return %arg0, %c0_i32 : i32, i32
  }
  func.func @transform_1(%arg0: i32, %arg1: i32) -> (i32, i32) {
    %c0_i32 = arith.constant 0 : i32
    return %arg0, %arg1 : i32, i32
  }
  func.func @transform_2(%arg0: i32, %arg1: i32) -> (i32, i32) {
    %c0_i32 = arith.constant 0 : i32
    return %arg0, %arg1 : i32, i32
  }
}

</mosaic_0001>

<bundles_post_ra>
// kernel: tpu_custom_call.1
= control target key start
LH: loop header
LB: loop body
LE: loop exit
PB: predicated region body
PF: predicated region fallthrough
CT: control target
= control target key end

     0   :  { %7 = vsyncpa [#allocation3], 0  ;;  %s720_s0 = inlined_call_operand.vmem [shape: f32[2,1], index: 0, kind: input, shape index: {}]   ;;  %s721_s1 = inlined_call_operand.hbm [shape: f32[2,1024], index: 1, kind: input, shape index: {}]   ;;  %s722_s2 = inlined_call_operand.hbm [shape: f32[2,1024], index: 2, kind: output, shape index: {}]  }
   0x1   :  { %9 = vsyncpa [#allocation3 + $0x1], 0 }
   0x2   :  { %10 = vsyncpa [#allocation4], 0 }
   0x3   :  { %12 = vsyncpa [#allocation4 + $0x1], 0  ;;  %s545_s9 = smov 0   ;;  %s547_s10 = smov 0  }
   0x4   :  { %s549_s11 = smov 0   ;;  %s551_s12 = smov 0  }
   0x5   :  { %s553_s13 = smov 0   ;;  %s555_s14 = smov 0  }
   0x6 LB: > { %s329_s15 = sadd.s32 4294967295, %s524_s14   ;;  %s330_s16 = sadd.s32 4294967294, %s524_s14   ;;  %s524_s14 = sphi %s555_s14, %s18_s14   ;;  %s520_s13 = sphi %s553_s13, %s738_s13   ;;  %s516_s12 = sphi %s551_s12, %s737_s12   ;;  %s512_s11 = sphi %s549_s11, %s736_s11   ;;  %s508_s10 = sphi %s547_s10, %s735_s10   ;;  %s504_s9 = sphi %s545_s9, %s734_s9  }
   0x7   : > { %s27_s17 = sadd.s32 1, %s520_s13  ;;  %s65_s18 = sadd.s32 1, %s512_s11 }
   0x8   : > { %p28_p0 = scmp.ge.s32.totalorder %s27_s17, 2  ;;  %p72_p1 = scmp.ne.s32.totalorder %s512_s11, %s508_s10 }
   0x9   : > { %p73_p2 = scmp.eq.s32.totalorder %s524_s14, 0  ;;  %p78_p3 = scmp.ne.s32.totalorder %s508_s10, %s504_s9 }
   0xa   : > { %s740_s17 = smov (%p28_p0, %s27_s17), 0  ;;  %p79_p5 = scmp.eq.s32.totalorder %s329_s15, 0 }
   0xb   : > { %p586_p4 = por %p73_p2, %p72_p1  ;;  %s61_s20 = ssub.s32 %s520_s13, %s740_s17 }
   0xc   : > { %p104_p6 = scmp.eq.s32.totalorder %s329_s15, 1  ;;  %p63_p7 = scmp.eq.s32.totalorder %s61_s20, 0 }
   0xd   : > { %p592_p8 = por %p79_p5, %p78_p3  ;;  %p110_p10 = scmp.eq.s32.totalorder %s330_s16, 1 }
   0xe   : > { %p596_p9 = por %p104_p6, %p72_p1  ;;  %p359_p13 = scmp.lt.s32.totalorder %s524_s14, 2 }
   0xf   : > { %s601_s23 = scalar_select %p63_p7, %s512_s11, %s65_s18  }
  0x10   : > { %s726_s22 = scalar_select %p596_p9, 1, 0 }
  0x11   : > { %p603_p11 = por %p110_p10, %p78_p3  ;;  %s137_s25 = sand.u32 1, %s512_s11  }
  0x12   : > { %s334_s26 = sshll.u32 %s137_s25, 3  ;;  %s345_s27 = sshll.u32 %s520_s13, 7 }
  0x13   : > { %s727_s24 = scalar_select %p603_p11, 1, 0 }
  0x14   : > { %s614_s30 = scalar_lea.hbm %s721_s1, %s345_s27  ;;  %s141_s3 = scalar_lea.vmem [#allocation2], %s334_s26 }
  0x15   : > { %s151_s4 = sshll.u32 %s141_s3, 4  ;;  %p620_p0 = pnand %p359_p13, %p586_p4  ;;  %s616_s4 = int_to_ptr.vmem [resolvable:$true] %s151_s4 }
  0x16   : > { %s138_s6 = scalar_lea.sflag [#allocation3], %s137_s25  ;;  %s412_s7 = scalar_lea.hbm %s614_s30, 128 }
  0x17   : > { %p413_p3 = scmp.ne.s32.totalorder %s614_s30, %s412_s7  ;;  %p414_p5 = pneg %p620_p0 }
  0x18   : > { %s417_s16 = scalar_lea.hbm %s721_s1, 256  ;;  %p418_p4 = scmp.lt.u32.totalorder %s614_s30, %s721_s1 }
  0x19   : > { %p415_p6 = pnand %p414_p5, %p413_p3  ;;  %p419_p10 = scmp.lt.u32.totalorder %s417_s16, %s412_s7 }
  0x1a   : > { %p421_p12 = scmp.lt.u32.totalorder %s412_s7, %s614_s30 }
  0x1b   : > { %p416_p7 = pneg %p415_p6  ;;  %p420_p13 = por %p419_p10, %p418_p4 }
  0x1d   : > { %p422_p1 = por %p421_p12, %p420_p13 }
  0x1f   : > { %p423_p2 = pnand %p422_p1, %p416_p7 }
  0x21   : > { %426 = shalt.err (!%p423_p2)
}
  0x22   : > { %s427_s20 = scalar_lea.vmem %s616_s4, 128  ;;  %s526_s25 = smov [#allocation2]  }
  0x23   : > { %p428_p3 = scmp.ne.s32.totalorder %s616_s4, %s427_s20  ;;  %s432_s26 = sshll.u32 %s526_s25, 4  ;;  %s433_s26 = int_to_ptr.vmem [resolvable:$false] %s432_s26 }
  0x24   : > { %s434_s27 = scalar_lea.vmem %s433_s26, 256  ;;  %p435_p9 = scmp.lt.s32.totalorder %s616_s4, %s433_s26 }
  0x25   : > { %p430_p6 = pnand %p428_p3, %p414_p5  ;;  %p436_p4 = scmp.lt.s32.totalorder %s434_s27, %s427_s20 }
  0x27   : > { %p431_p11 = pneg %p430_p6  ;;  %p437_p10 = por %p436_p4, %p435_p9 }
  0x29   : > { %p438_p12 = pnand %p437_p10, %p431_p11 }
  0x2b   : > { %441 = shalt.err (!%p438_p12)
}
  0x2c   : > { %354 = dma.hbm_to_vmem [thread:$0]  (!%p620_p0), %s614_s30, 128, %s616_s4, %s138_s6  }
  0x2d   : > { %p729_p1 = scmp.lt.s32.totalorder %s524_s14, 3  ;;  %p730_p2 = scmp.ge.s32.totalorder %s524_s14, 1 }
  0x2f   : > { %p157_p5 = pnand %p730_p2, %p729_p1 }
  0x30   : > { %s656_s28 = sand.u32 (!%p157_p5), 1, %s508_s10  }
  0x31   : > { %160 = sbr.rel (%p157_p5) target bundleno = 205 (0xcd), region = 28  ;;  %s338_s29 = sshll.u32 (!%p157_p5), %s656_s28, 3 }
  0x32   : > { %s163_s3 = scalar_lea.sflag (!%p157_p5), [#allocation3], %s656_s28  ;;  %s166_s7 = scalar_lea.vmem (!%p157_p5), [#allocation2], %s338_s29 }
  0x38   : > { %495 = dma.done.wait (%p592_p8), %s163_s3, 128  }
  0x39   : > { %497 = vsyncadd (%p592_p8), %s163_s3, 4294967168  ;;  %v527_v0 = vmov 0   ;;  %v198_v1 = vld [vmem:[%s720_s0] sm:$0x3]  ;;  %v528_v2 = vmov 269488144   ;;  %v206_v4 = vlaneseq }
  0x3a   : > { %411 = vset.pattern.permute.xlu0 %v527_v0  ;;  %v204_v3 = vunpack.c.l.s4 %v528_v2  ;;  %v197_v9 = vld [vmem:[%s166_s7] sm:$0xff]  ;;  %s346_s21 = sshll.u32 %s516_s12, 7  ;;  %s190_s5 = scalar_lea.vmem [#allocation5], %s338_s29 }
  0x3b   : > { %201 = vperm.xlu0 %411, %v198_v1   ;;  %v207_v6 = vshrl.u32 %v206_v4, 7  ;;  %s230_s6 = sshll.u32 %s190_s5, 4  ;;  %s671_s16 = scalar_lea.hbm %s722_s2, %s346_s21  ;;  %s673_s6 = int_to_ptr.vmem [resolvable:$true] %s230_s6 }
  0x3c   : > { %v205_v5 = vunpack.c.0.s8 %v204_v3  ;;  %s214_s18 = scalar_lea.sflag [#allocation4], %s656_s28  ;;  %s442_s19 = scalar_lea.vmem %s673_s6, 128 }
  0x3d   : > { %p443_p8 = scmp.ne.s32.totalorder %s673_s6, %s442_s19  ;;  %p731_p9 = scmp.ne.s32.totalorder %s726_s22, 0 }
  0x3e   : > { %v208_v7 = vsub.s32 %v205_v5, %v207_v6  ;;  %s529_s12 = smov [#allocation5]  }
  0x3f   : > { %p444_p11 = pnand %p443_p8, %p731_p9  ;;  %s446_s20 = sshll.u32 %s529_s12, 4  ;;  %s447_s20 = int_to_ptr.vmem [resolvable:$false] %s446_s20 }
  0x40   : > { %s448_s25 = scalar_lea.vmem %s447_s20, 256  ;;  %p449_p7 = scmp.lt.s32.totalorder %s673_s6, %s447_s20 }
  0x41   : > { %p445_p0 = pneg %p444_p11  ;;  %p450_p13 = scmp.lt.s32.totalorder %s448_s25, %s442_s19 }
  0x43   : > { %p451_p3 = por %p450_p13, %p449_p7 }
  0x45   : > { %p452_p6 = pnand %p451_p3, %p445_p0 }
  0xba   : > { %v202_v8 = vpop.permute.xlu0 %201 }
  0xbb   : > { %v209_v10 = vrot.slane %v202_v8, %v208_v7 }
  0xbd   : > { %v211_v11 = vmul.f32 %v209_v10, %v197_v9 }
  0xbf   : > { %212 = vst [vmem:[%s190_s5] sm:$0xff] %v211_v11 }
  0xc0   : > { %455 = shalt.err (!%p452_p6)
}
  0xc1   : > { %s456_s26 = scalar_lea.hbm %s671_s16, 128  ;;  %s460_s29 = scalar_lea.hbm %s722_s2, 256 }
  0xc2   : > { %p457_p4 = scmp.ne.s32.totalorder %s671_s16, %s456_s26  ;;  %p461_p1 = scmp.lt.u32.totalorder %s671_s16, %s722_s2 }
  0xc3   : > { %p462_p2 = scmp.lt.u32.totalorder %s460_s29, %s456_s26  ;;  %p464_p8 = scmp.lt.u32.totalorder %s456_s26, %s671_s16 }
  0xc4   : > { %p458_p10 = pnand %p457_p4, %p731_p9 }
  0xc5   : > { %p463_p5 = por %p462_p2, %p461_p1 }
  0xc6   : > { %p459_p12 = pneg %p458_p10 }
  0xc7   : > { %p465_p11 = por %p464_p8, %p463_p5 }
  0xc9   : > { %p466_p0 = pnand %p465_p11, %p459_p12 }
  0xcb   : > { %469 = shalt.err (!%p466_p0)
}
  0xcc   : > { %349 = dma.vmem_to_hbm [thread:$0]  (%p731_p9), %s673_s6, 128, %s671_s16, %s214_s18  }
  0xcd PF: > { %s242_s30 = sand.u32 1, %s504_s9   ;;  %p732_p7 = scmp.ne.s32.totalorder %s727_s24, 0 }
  0xce   : > { %p733_p13 = scmp.ge.s32.totalorder %s524_s14, 2  ;;  %s243_s4 = scalar_lea.sflag [#allocation4], %s242_s30 }
  0xd0   : > { %p356_p3 = pnand %p733_p13, %p732_p7 }
  0xd2   : > { %499 = dma.done.wait (!%p356_p3), %s243_s4, 128  }
  0xd3   : > { %501 = vsyncadd (!%p356_p3), %s243_s4, 4294967168  ;;  %s18_s14 = sadd.s32 1, %s524_s14   ;;  %s734_s9 = smov %s508_s10 }
  0xd4   : > { %p15_p6 = scmp.ge.s32.totalorder %s18_s14, 4   ;;  %s735_s10 = smov %s512_s11 }
  0xd5   : > { %s736_s11 = smov %s601_s23  ;;  %s737_s12 = smov %s520_s13 }
  0xd6   : > { %s738_s13 = smov %s740_s17  ;;  %17 = sbr.rel (!%p15_p6) target bundleno = 6 (0x6), region = 76 }
  0xdd   :  { %248 = vsyncpa [#allocation3], 1 }
  0xde   :  { %250 = vsyncpa [#allocation3 + $0x1], 1 }
  0xdf   :  { %251 = vsyncpa [#allocation4], 1 }
  0xe0   :  { %253 = vsyncpa [#allocation4 + $0x1], 1 }

</bundles_post_ra>
